<compile_context>
chip_gen: v7x
topology: tpu7x:2x2x1
jax: 0.10.0
libtpu: 0.0.40
codegen_flags: <defaults>
</compile_context>

<pallas_src>
import functools
import math

import jax
import jax.numpy as jnp
from jax.experimental import pallas as pl
from jax.experimental.pallas import tpu as pltpu


# ----------------------------- kernel ---------------------------------------
def _pe_add_kernel(x_ref, pe_ref, o_ref, *, batch):
    # x_ref:  [block_l, B*D]   (batch flattened into lanes)
    # pe_ref: [block_l, D]     (pre-cast to x dtype)
    pe_b = jnp.tile(pe_ref[...], (1, batch))          # [block_l, B*D] lane copies
    o_ref[...] = (x_ref[...] + pe_b).astype(o_ref.dtype)


# ----------------------------- wrapper ---------------------------------------
_X_BLOCK_BYTES = 2 * 1024 * 1024  # ~2 MiB per x tile: amortizes step overhead,
                                  # stays well inside v5e/v7x scoped-VMEM defaults.


def positional_encoding_forward(x, pe_table):
    """x: [L, B, D]; pe_table: [max_len, D] float32 (sinusoidal buffer)."""
    L, B, D = x.shape
    max_len, d2 = pe_table.shape
    assert d2 == D and max_len >= L

    x2 = x.reshape(L, B * D)                      # lane-dense layout
    pe_in = pe_table[:L].astype(x.dtype)          # pre-cast: no f32 pe DMA for bf16 x

    row_bytes = B * D * x.dtype.itemsize
    block_l = max(8, ((_X_BLOCK_BYTES // row_bytes) // 8) * 8)
    if block_l >= L:
        block_l = L                               # single full-extent block
    grid = (pl.cdiv(L, block_l),)                 # ragged last block is fine

    kernel = functools.partial(_pe_add_kernel, batch=B)

    y2 = pl.pallas_call(
        kernel,
        out_shape=jax.ShapeDtypeStruct((L, B * D), x.dtype),
        grid=grid,
        in_specs=[
            pl.BlockSpec((block_l, B * D), lambda i: (i, 0)),  # x tile
            pl.BlockSpec((block_l, D), lambda i: (i, 0)),      # pe rows, same positions
        ],
        out_specs=pl.BlockSpec((block_l, B * D), lambda i: (i, 0)),
        input_output_aliases={0: 0},              # in-place add into (reshaped) x
        compiler_params=pltpu.CompilerParams(
            dimension_semantics=("parallel",),    # engages 2nd TC on v7x
        ),
    )(x2, pe_in)
    return y2.reshape(L, B, D)


# ----------------------------- pe buffer (host, mirrors PyTorch __init__) ----
def make_pe_table(d_model, max_len=5000):
    position = jnp.arange(max_len, dtype=jnp.float32)[:, None]            # [max_len, 1]
    div_term = jnp.exp(
        jnp.arange(0, d_model, 2, dtype=jnp.float32) * (-math.log(10000.0) / d_model)
    )                                                                      # [d_model/2]
    ang = position * div_term                                              # [max_len, d_model/2]
    pe = jnp.zeros((max_len, d_model), jnp.float32)
    pe = pe.at[:, 0::2].set(jnp.sin(ang))
    pe = pe.at[:, 1::2].set(jnp.cos(ang))
    return pe


# ----------------------------- demo -------------------------------------------
if __name__ == "__main__":
    SEQ_LEN = 16     # sequence length (L)
    BATCH = 2        # batch size (B)
    D_MODEL = 128    # embed dim (lane-dense: multiple of 128)
    MAX_LEN = 5000   # PyTorch default

    key = jax.random.PRNGKey(0)
    x = jax.random.normal(key, (SEQ_LEN, BATCH, D_MODEL), dtype=jnp.float32)
    pe_table = make_pe_table(D_MODEL, MAX_LEN)

    # reference (pure jnp) — same math as PyTorch forward in eval mode;
    # computed before the kernel call (output aliases its input buffer).
    ref = x + pe_table[:SEQ_LEN][:, None, :]
    ref = jax.block_until_ready(ref)

    y = positional_encoding_forward(x, pe_table)
    y = jax.block_until_ready(y)

    assert y.shape == (SEQ_LEN, BATCH, D_MODEL), y.shape
    assert bool(jnp.all(jnp.isfinite(y)))
    assert bool(jnp.max(jnp.abs(y - ref)) < 1e-6)
    print("KERNEL_OK")
</pallas_src>

<mosaic_0001>
module attributes {stable_mosaic.version = 11 : i64} {
  func.func @_pe_add_kernel(%arg0: i32, %arg1: memref<16x256xf32, #tpu.memory_space<vmem>>, %arg2: memref<16x128xf32, #tpu.memory_space<vmem>>, %arg3: memref<16x256xf32, #tpu.memory_space<vmem>>) attributes {dimension_semantics = [#tpu.dimension_semantics<parallel>], iteration_bounds = array<i64: 1>, scalar_prefetch = 0 : i64, scratch_operands = 0 : i64, tpu.core_type = #tpu.core_type<tc>, window_params = [{transform_indices = @transform_0, window_bounds = array<i64: 16, 256>}, {transform_indices = @transform_1, window_bounds = array<i64: 16, 128>}, {transform_indices = @transform_2, window_bounds = array<i64: 16, 256>}]} {
    %c0 = arith.constant 0 : index
    %c0_0 = arith.constant 0 : index
    %0 = vector.load %arg2[%c0, %c0_0] : memref<16x128xf32, #tpu.memory_space<vmem>>, vector<16x128xf32>
    %1 = tpu.concatenate %0, %0 in 1 : vector<16x128xf32>, vector<16x128xf32> -> vector<16x256xf32>
    %c0_1 = arith.constant 0 : index
    %c0_2 = arith.constant 0 : index
    %2 = vector.load %arg1[%c0_1, %c0_2] : memref<16x256xf32, #tpu.memory_space<vmem>>, vector<16x256xf32>
    %3 = arith.addf %2, %1 : vector<16x256xf32>
    %c0_3 = arith.constant 0 : index
    %c0_4 = arith.constant 0 : index
    %4 = vector.load %arg3[%c0_3, %c0_4] : memref<16x256xf32, #tpu.memory_space<vmem>>, vector<16x256xf32>
    tpu.vector_store %arg3[%c0_3, %c0_4], %3 {strides = array<i32>} : memref<16x256xf32, #tpu.memory_space<vmem>>, vector<16x256xf32>,
    return
  }
  func.func @transform_0(%arg0: i32) -> (i32, i32) {
    %c0_i32 = arith.constant 0 : i32
    %c0_i32_0 = arith.constant 0 : i32
    return %arg0, %c0_i32 : i32, i32
  }
  func.func @transform_1(%arg0: i32) -> (i32, i32) {
    %c0_i32 = arith.constant 0 : i32
    %c0_i32_0 = arith.constant 0 : i32
    return %arg0, %c0_i32 : i32, i32
  }
  func.func @transform_2(%arg0: i32) -> (i32, i32) {
    %c0_i32 = arith.constant 0 : i32
    %c0_i32_0 = arith.constant 0 : i32
    return %arg0, %c0_i32 : i32, i32
  }
}

</mosaic_0001>

<bundles_post_ra>
// kernel: tpu_custom_call.1
= control target key start
LH: loop header
LB: loop body
LE: loop exit
PB: predicated region body
PF: predicated region fallthrough
CT: control target
= control target key end

     0   :  { %7 = vsyncpa [#allocation3], 0  ;;  %s164_s0 = inlined_call_operand.hbm [shape: f32[16,256], index: 0, kind: input, shape index: {}, may-alias: {0,2}]   ;;  %s165_s1 = inlined_call_operand.vmem [shape: f32[16,128], index: 1, kind: input, shape index: {}]   ;;  %s166_s2 = inlined_call_operand.hbm [shape: f32[16,256], index: 2, kind: output, shape index: {}, may-alias: {0,2}]  }
   0x1   :  { %8 = vsyncpa [#allocation4], 0  ;;  %s109_s9 = smov [#allocation2]   ;;  %s61_s13 = scalar_lea.hbm %s164_s0, 512 }
   0x2   :  { %s14_s10 = sshll.u32 %s109_s9, 4  ;;  %p62_p0 = scmp.ne.s32.totalorder %s164_s0, %s61_s13  ;;  %s15_s10 = int_to_ptr.vmem [resolvable:$true] %s14_s10 }
   0x3   :  { %p65_p1 = scmp.lt.u32.totalorder %s61_s13, %s164_s0 }
   0x5   :  { %p67_p2 = pnand %p65_p1, %p62_p0 }
   0x7   :  { %70 = shalt.err (!%p67_p2)
}
   0x8   :  { %s71_s18 = scalar_lea.vmem %s15_s10, 512  ;;  %p76_p4 = scmp.lt.s32.totalorder %s15_s10, %s15_s10 }
   0x9   :  { %p72_p3 = scmp.ne.s32.totalorder %s15_s10, %s71_s18  ;;  %p77_p5 = scmp.lt.s32.totalorder %s71_s18, %s71_s18 }
   0xb   :  { %p78_p6 = por %p77_p5, %p76_p4 }
   0xd   :  { %p79_p7 = pnand %p78_p6, %p72_p3 }
   0xf   :  { %82 = shalt.err (!%p79_p7)
}
  0x10   :  { %s110_s19 = smov 256   ;;  %s111_s20 = smov 16  }
  0x11   :  { %20 = dma.hbm_to_vmem [thread:$0]  %s164_s0, 512, %s15_s10, [#allocation3], %s110_s19, %s110_s19, %s111_s20  }
  0x12   :  { %105 = dma.done.wait [#allocation3], 512  }
  0x13   :  { %106 = vsyncadd [#allocation3], 4294966784  ;;  %s112_s23 = smov [#allocation5]   ;;  %v26_v0 = vld [vmem:[%s165_s1] sm:$0xff]  ;;  %v29_v2 = vld [vmem:[#allocation2 + $0x8] sm:$0xff] }
  0x14   :  { %s45_s24 = sshll.u32 %s112_s23, 4  ;;  %v28_v1 = vld [vmem:[#allocation2] sm:$0xff]  ;;  %v33_v4 = vadd.f32 %v29_v2, %v26_v0  ;;  %v27_v5 = vld [vmem:[%s165_s1 + $0x8] sm:$0xff]  ;;  %v30_v6 = vld [vmem:[#allocation2 + $0x10] sm:$0xff]  ;;  %s46_s24 = int_to_ptr.vmem [resolvable:$true] %s45_s24 }
  0x15   :  { %v32_v3 = vadd.f32 %v28_v1, %v26_v0  ;;  %v31_v7 = vld [vmem:[#allocation2 + $0x18] sm:$0xff]  ;;  %v34_v8 = vadd.f32 %v30_v6, %v27_v5  ;;  %s83_s0 = scalar_lea.vmem %s46_s24, 512  ;;  %p88_p9 = scmp.lt.s32.totalorder %s46_s24, %s46_s24 }
  0x16   :  { %v35_v9 = vadd.f32 %v31_v7, %v27_v5  ;;  %37 = vst [vmem:[#allocation5 + $0x8] sm:$0xff] %v33_v4  ;;  %p84_p8 = scmp.ne.s32.totalorder %s46_s24, %s83_s0  ;;  %p89_p10 = scmp.lt.s32.totalorder %s83_s0, %s83_s0 }
  0x17   :  { %36 = vst [vmem:[#allocation5] sm:$0xff] %v32_v3  ;;  %38 = vst [vmem:[#allocation5 + $0x10] sm:$0xff] %v34_v8 }
  0x18   :  { %39 = vst [vmem:[#allocation5 + $0x18] sm:$0xff] %v35_v9  ;;  %p90_p11 = por %p89_p10, %p88_p9 }
  0x1a   :  { %p91_p12 = pnand %p90_p11, %p84_p8 }
  0x1c   :  { %94 = shalt.err (!%p91_p12)
}
  0x1d   :  { %s95_s1 = scalar_lea.hbm %s166_s2, 512 }
  0x1e   :  { %p96_p13 = scmp.ne.s32.totalorder %s166_s2, %s95_s1  ;;  %p99_p0 = scmp.lt.u32.totalorder %s95_s1, %s166_s2 }
  0x20   :  { %p101_p1 = pnand %p99_p0, %p96_p13 }
  0x22   :  { %104 = shalt.err (!%p101_p1)
}
  0x23   :  { %51 = dma.vmem_to_hbm [thread:$0]  %s46_s24, 512, %s166_s2, [#allocation4], %s110_s19, %s110_s19, %s111_s20  }
  0x24   :  { %107 = dma.done.wait [#allocation4], 512  }
  0x25   :  { %108 = vsyncadd [#allocation4], 4294966784 }
  0x26   :  { %55 = vsyncpa [#allocation3], 1 }
  0x27   :  { %56 = vsyncpa [#allocation4], 1 }

</bundles_post_ra>
